<compile_context>
chip_gen: v7x
topology: tpu7x:2x2x1
jax: 0.10.0
libtpu: 0.0.40
codegen_flags: <defaults>
</compile_context>

<pallas_src>
import jax
import jax.numpy as jnp
from jax.experimental import pallas as pl
from jax.experimental.pallas import tpu as pltpu

_LANE = 128          # lane-dense output width for the padded classifier
_NEG = -1.0e30       # padded-class logit (exp underflows to 0 in f32)


# ---------------------------------------------------------------------------
# Fused 3-layer kernel
# ---------------------------------------------------------------------------
def _fused_forward_kernel(adjz_ref, adj_ref, x_ref, m_ref, z_ref,
                          w0_ref, b0_ref, w1_ref, b1_ref, w2_ref, b2_ref,
                          out_ref):
    # bf16-streamed adjacencies -> f32 for the MXU
    adjz = adjz_ref[...].astype(jnp.float32)
    adj = adj_ref[...].astype(jnp.float32)

    # ---- layer 0: PaGConv(nfeat -> nhid) on adjZ, BN0 folded, ReLU ----------
    # reorder: adjZ @ ((M*x) @ W0) ; the [N,1] row-scale Z commutes with @W0.
    y0 = jnp.dot(x_ref[...] * m_ref[...], w0_ref[...],
                 preferred_element_type=jnp.float32)          # [N, nhid]
    h = jnp.dot(adjz, y0, preferred_element_type=jnp.float32) # [N, nhid]
    h = jnp.maximum(h * z_ref[...] + b0_ref[...], 0.0)
    # dropout: eval mode -> identity

    # ---- layer 1: GConv(nhid -> nhid) on adj, BN1 folded, ReLU --------------
    y1 = jnp.dot(h, w1_ref[...], preferred_element_type=jnp.float32)
    h = jnp.maximum(jnp.dot(adj, y1, preferred_element_type=jnp.float32)
                    + b1_ref[...], 0.0)

    # ---- layer 2: GConv(nhid -> nclass, padded to 128 lanes), log_softmax ---
    y2 = jnp.dot(h, w2_ref[...], preferred_element_type=jnp.float32)
    o = jnp.dot(adj, y2, preferred_element_type=jnp.float32) + b2_ref[...]
    mmax = jnp.max(o, axis=-1, keepdims=True)
    zc = o - mmax
    lse = jnp.log(jnp.sum(jnp.exp(zc), axis=-1, keepdims=True))
    out_ref[...] = zc - lse


# ---------------------------------------------------------------------------
# Host-side helpers
# ---------------------------------------------------------------------------
def _fold_bn(w, b, bn_params, eps=1e-5):
    """Fold eval-mode BatchNorm1d into the preceding linear layer."""
    gamma, beta, mean, var = bn_params
    s = gamma * jax.lax.rsqrt(var + eps)          # [1, Fout]
    return w * s, (b - mean) * s + beta


def pagcn_forward(params, x, adj, adjz, M, Z):
    N, nfeat = x.shape
    nhid = params["w0"].shape[1]
    nclass = params["w2"].shape[1]

    # Fold BN into W/b (host side, zero kernel cost).
    w0, b0 = _fold_bn(params["w0"], params["b0"], params["bn0"])
    w1, b1 = _fold_bn(params["w1"], params["b1"], params["bn1"])
    # Pad the classifier to a lane-dense 128-wide output.
    w2 = jnp.zeros((nhid, _LANE), jnp.float32).at[:, :nclass].set(params["w2"])
    b2 = jnp.full((1, _LANE), _NEG, jnp.float32).at[:, :nclass].set(params["b2"])

    # Stream the dominant [N,N] operands as bf16.
    adj_bf = adj.astype(jnp.bfloat16)
    adjz_bf = adjz.astype(jnp.bfloat16)

    def full(shape):
        return pl.BlockSpec(shape, lambda i: (0,) * len(shape))

    out = pl.pallas_call(
        _fused_forward_kernel,
        out_shape=jax.ShapeDtypeStruct((N, _LANE), jnp.float32),
        grid=(1,),
        in_specs=[
            full((N, N)),          # adjZ (bf16)
            full((N, N)),          # adj  (bf16)
            full((N, nfeat)),      # x
            full((N, 1)),          # M  (pre mask)
            full((N, 1)),          # Z  (post mask)
            full((nfeat, nhid)),   # W0 (BN-folded)
            full((1, nhid)),       # b0
            full((nhid, nhid)),    # W1 (BN-folded)
            full((1, nhid)),       # b1
            full((nhid, _LANE)),   # W2 (lane-padded)
            full((1, _LANE)),      # b2 (lane-padded, -1e30 in pad)
        ],
        out_specs=full((N, _LANE)),
        compiler_params=pltpu.CompilerParams(
            dimension_semantics=("arbitrary",)),
    )(adjz_bf, adj_bf, x, M, Z, w0, b0, w1, b1, w2, b2)
    return out[:, :nclass]


# ---------------------------------------------------------------------------
# Parameter init (deterministic; shapes from the module's __init__)
# ---------------------------------------------------------------------------
def xavier_uniform(key, fan_in, fan_out, gain=1.0):
    bound = gain * jnp.sqrt(6.0 / (fan_in + fan_out))
    # stored already transposed to [fan_in, fan_out]
    return jax.random.uniform(key, (fan_in, fan_out), jnp.float32,
                              minval=-bound, maxval=bound)


def init_model_params(key, nfeat, nhid, nclass):
    k0, k1, k2 = jax.random.split(key, 3)
    bn_reset = lambda f: (jnp.ones((1, f)), jnp.zeros((1, f)),
                          jnp.zeros((1, f)), jnp.ones((1, f)))
    return {
        # PaGConv(nfeat, nhid): xavier_uniform gain=1.414, bias=0
        "w0": xavier_uniform(k0, nfeat, nhid, gain=1.414),
        "b0": jnp.zeros((1, nhid), jnp.float32),
        # TODO(synk): GConv is not defined in the source; assumed to be the
        # standard GCN layer  out = Linear(spmm(adj, x)).
        "w1": xavier_uniform(k1, nhid, nhid, gain=1.414),
        "b1": jnp.zeros((1, nhid), jnp.float32),
        "w2": xavier_uniform(k2, nhid, nclass, gain=1.414),
        "b2": jnp.zeros((1, nclass), jnp.float32),
        # BatchNorm1d after reset_parameters(): gamma=1, beta=0, mean=0, var=1
        "bn0": bn_reset(nhid),
        "bn1": bn_reset(nhid),
    }


# ---------------------------------------------------------------------------
# Pure-JAX reference (original op order, eval-mode BN) for correctness
# ---------------------------------------------------------------------------
def reference_forward(params, x, adj, adjz, M, Z, eps=1e-5):
    def bn(h, bnp):
        g, b, m, v = bnp
        return (h - m) * jax.lax.rsqrt(v + eps) * g + b

    h = (adjz @ (M * x)) * Z
    h = h @ params["w0"] + params["b0"]
    h = jnp.maximum(bn(h, params["bn0"]), 0.0)

    h = adj @ h
    h = h @ params["w1"] + params["b1"]
    h = jnp.maximum(bn(h, params["bn1"]), 0.0)

    h = adj @ h
    h = h @ params["w2"] + params["b2"]
    return jax.nn.log_softmax(h, axis=-1)


if __name__ == "__main__":
    N, NFEAT, NHID, NCLASS = 64, 32, 16, 8

    key = jax.random.PRNGKey(0)
    kx, ka, kaz, km, kz, kp = jax.random.split(key, 6)

    x = jax.random.normal(kx, (N, NFEAT), jnp.float32)
    # synthetic dense normalized-ish adjacencies, snapped to the bf16 grid so
    # the bf16-streamed kernel and the f32 reference consume identical values
    adj = (jax.random.uniform(ka, (N, N), jnp.float32) / N
           ).astype(jnp.bfloat16).astype(jnp.float32)
    adjz = (jax.random.uniform(kaz, (N, N), jnp.float32) / N
            ).astype(jnp.bfloat16).astype(jnp.float32)
    M = jax.random.uniform(km, (N, 1), jnp.float32)    # per-node pre mask
    Z = jax.random.uniform(kz, (N, 1), jnp.float32)    # per-node post mask

    params = init_model_params(kp, NFEAT, NHID, NCLASS)

    out = pagcn_forward(params, x, adj, adjz, M, Z)
    out = jax.block_until_ready(out)

    ref = reference_forward(params, x, adj, adjz, M, Z)
    assert out.shape == (N, NCLASS)
    assert jnp.allclose(out, ref, atol=1e-4, rtol=1e-4), (
        "Pallas output diverged from reference")

    print("KERNEL_OK")
</pallas_src>

<mosaic_0001>
module attributes {stable_mosaic.version = 11 : i64} {
  func.func @_fused_forward_kernel(%arg0: i32, %arg1: memref<64x64xbf16, #tpu.memory_space<vmem>>, %arg2: memref<64x64xbf16, #tpu.memory_space<vmem>>, %arg3: memref<64x32xf32, #tpu.memory_space<vmem>>, %arg4: memref<64x1xf32, #tpu.memory_space<vmem>>, %arg5: memref<64x1xf32, #tpu.memory_space<vmem>>, %arg6: memref<32x16xf32, #tpu.memory_space<vmem>>, %arg7: memref<1x16xf32, #tpu.memory_space<vmem>>, %arg8: memref<16x16xf32, #tpu.memory_space<vmem>>, %arg9: memref<1x16xf32, #tpu.memory_space<vmem>>, %arg10: memref<16x128xf32, #tpu.memory_space<vmem>>, %arg11: memref<1x128xf32, #tpu.memory_space<vmem>>, %arg12: memref<64x128xf32, #tpu.memory_space<vmem>>) attributes {dimension_semantics = [#tpu.dimension_semantics<arbitrary>], iteration_bounds = array<i64: 1>, scalar_prefetch = 0 : i64, scratch_operands = 0 : i64, tpu.core_type = #tpu.core_type<tc>, window_params = [{pipeline_mode = #tpu.pipeline_mode<synchronous>, transform_indices = @transform_0, window_bounds = array<i64: 64, 64>}, {pipeline_mode = #tpu.pipeline_mode<synchronous>, transform_indices = @transform_1, window_bounds = array<i64: 64, 64>}, {pipeline_mode = #tpu.pipeline_mode<synchronous>, transform_indices = @transform_2, window_bounds = array<i64: 64, 32>}, {pipeline_mode = #tpu.pipeline_mode<synchronous>, transform_indices = @transform_3, window_bounds = array<i64: 64, 1>}, {pipeline_mode = #tpu.pipeline_mode<synchronous>, transform_indices = @transform_4, window_bounds = array<i64: 64, 1>}, {pipeline_mode = #tpu.pipeline_mode<synchronous>, transform_indices = @transform_5, window_bounds = array<i64: 32, 16>}, {pipeline_mode = #tpu.pipeline_mode<synchronous>, transform_indices = @transform_6, window_bounds = array<i64: 1, 16>}, {pipeline_mode = #tpu.pipeline_mode<synchronous>, transform_indices = @transform_7, window_bounds = array<i64: 16, 16>}, {pipeline_mode = #tpu.pipeline_mode<synchronous>, transform_indices = @transform_8, window_bounds = array<i64: 1, 16>}, {pipeline_mode = #tpu.pipeline_mode<synchronous>, transform_indices = @transform_9, window_bounds = array<i64: 16, 128>}, {pipeline_mode = #tpu.pipeline_mode<synchronous>, transform_indices = @transform_10, window_bounds = array<i64: 1, 128>}, {pipeline_mode = #tpu.pipeline_mode<synchronous>, transform_indices = @transform_11, window_bounds = array<i64: 64, 128>}]} {
    %c0 = arith.constant 0 : index
    %c0_0 = arith.constant 0 : index
    %0 = vector.load %arg1[%c0, %c0_0] : memref<64x64xbf16, #tpu.memory_space<vmem>>, vector<64x64xbf16>
    %1 = arith.extf %0 : vector<64x64xbf16> to vector<64x64xf32>
    %c0_1 = arith.constant 0 : index
    %c0_2 = arith.constant 0 : index
    %2 = vector.load %arg2[%c0_1, %c0_2] : memref<64x64xbf16, #tpu.memory_space<vmem>>, vector<64x64xbf16>
    %3 = arith.extf %2 : vector<64x64xbf16> to vector<64x64xf32>
    %c0_3 = arith.constant 0 : index
    %c0_4 = arith.constant 0 : index
    %4 = vector.load %arg3[%c0_3, %c0_4] : memref<64x32xf32, #tpu.memory_space<vmem>>, vector<64x32xf32>
    %c0_5 = arith.constant 0 : index
    %c0_6 = arith.constant 0 : index
    %5 = vector.load %arg4[%c0_5, %c0_6] : memref<64x1xf32, #tpu.memory_space<vmem>>, vector<64x1xf32>
    %6 = vector.broadcast %5 : vector<64x1xf32> to vector<64x32xf32>
    %7 = arith.mulf %4, %6 : vector<64x32xf32>
    %c0_7 = arith.constant 0 : index
    %c0_8 = arith.constant 0 : index
    %8 = vector.load %arg6[%c0_7, %c0_8] : memref<32x16xf32, #tpu.memory_space<vmem>>, vector<32x16xf32>
    %cst = arith.constant dense<0.000000e+00> : vector<64x16xf32>
    %9 = tpu.matmul %7, %8, %cst {dimension_numbers = #tpu.dot_dimension_numbers<[1], [0], [0], [1], [0, 0, 1, 1], [], []>} : vector<64x32xf32>, vector<32x16xf32>, vector<64x16xf32> -> vector<64x16xf32>
    %cst_9 = arith.constant dense<0.000000e+00> : vector<64x16xf32>
    %10 = tpu.matmul %1, %9, %cst_9 {dimension_numbers = #tpu.dot_dimension_numbers<[1], [0], [0], [1], [0, 0, 1, 1], [], []>} : vector<64x64xf32>, vector<64x16xf32>, vector<64x16xf32> -> vector<64x16xf32>
    %c0_10 = arith.constant 0 : index
    %c0_11 = arith.constant 0 : index
    %11 = vector.load %arg5[%c0_10, %c0_11] : memref<64x1xf32, #tpu.memory_space<vmem>>, vector<64x1xf32>
    %12 = vector.broadcast %11 : vector<64x1xf32> to vector<64x16xf32>
    %13 = arith.mulf %10, %12 : vector<64x16xf32>
    %c0_12 = arith.constant 0 : index
    %c0_13 = arith.constant 0 : index
    %14 = vector.load %arg7[%c0_12, %c0_13] : memref<1x16xf32, #tpu.memory_space<vmem>>, vector<1x16xf32>
    %15 = vector.broadcast %14 : vector<1x16xf32> to vector<64x16xf32>
    %16 = arith.addf %13, %15 : vector<64x16xf32>
    %cst_14 = arith.constant 0.000000e+00 : f32
    %17 = vector.broadcast %cst_14 : f32 to vector<64x16xf32>
    %18 = arith.maximumf %16, %17 : vector<64x16xf32>
    %c0_15 = arith.constant 0 : index
    %c0_16 = arith.constant 0 : index
    %19 = vector.load %arg8[%c0_15, %c0_16] : memref<16x16xf32, #tpu.memory_space<vmem>>, vector<16x16xf32>
    %cst_17 = arith.constant dense<0.000000e+00> : vector<64x16xf32>
    %20 = tpu.matmul %18, %19, %cst_17 {dimension_numbers = #tpu.dot_dimension_numbers<[1], [0], [0], [1], [0, 0, 1, 1], [], []>} : vector<64x16xf32>, vector<16x16xf32>, vector<64x16xf32> -> vector<64x16xf32>
    %cst_18 = arith.constant dense<0.000000e+00> : vector<64x16xf32>
    %21 = tpu.matmul %3, %20, %cst_18 {dimension_numbers = #tpu.dot_dimension_numbers<[1], [0], [0], [1], [0, 0, 1, 1], [], []>} : vector<64x64xf32>, vector<64x16xf32>, vector<64x16xf32> -> vector<64x16xf32>
    %c0_19 = arith.constant 0 : index
    %c0_20 = arith.constant 0 : index
    %22 = vector.load %arg9[%c0_19, %c0_20] : memref<1x16xf32, #tpu.memory_space<vmem>>, vector<1x16xf32>
    %23 = vector.broadcast %22 : vector<1x16xf32> to vector<64x16xf32>
    %24 = arith.addf %21, %23 : vector<64x16xf32>
    %cst_21 = arith.constant 0.000000e+00 : f32
    %25 = vector.broadcast %cst_21 : f32 to vector<64x16xf32>
    %26 = arith.maximumf %24, %25 : vector<64x16xf32>
    %c0_22 = arith.constant 0 : index
    %c0_23 = arith.constant 0 : index
    %27 = vector.load %arg10[%c0_22, %c0_23] : memref<16x128xf32, #tpu.memory_space<vmem>>, vector<16x128xf32>
    %cst_24 = arith.constant dense<0.000000e+00> : vector<64x128xf32>
    %28 = tpu.matmul %26, %27, %cst_24 {dimension_numbers = #tpu.dot_dimension_numbers<[1], [0], [0], [1], [0, 0, 1, 1], [], []>} : vector<64x16xf32>, vector<16x128xf32>, vector<64x128xf32> -> vector<64x128xf32>
    %cst_25 = arith.constant dense<0.000000e+00> : vector<64x128xf32>
    %29 = tpu.matmul %3, %28, %cst_25 {dimension_numbers = #tpu.dot_dimension_numbers<[1], [0], [0], [1], [0, 0, 1, 1], [], []>} : vector<64x64xf32>, vector<64x128xf32>, vector<64x128xf32> -> vector<64x128xf32>
    %c0_26 = arith.constant 0 : index
    %c0_27 = arith.constant 0 : index
    %30 = vector.load %arg11[%c0_26, %c0_27] : memref<1x128xf32, #tpu.memory_space<vmem>>, vector<1x128xf32>
    %31 = vector.broadcast %30 : vector<1x128xf32> to vector<64x128xf32>
    %32 = arith.addf %29, %31 : vector<64x128xf32>
    %cst_28 = arith.constant dense<0xFF800000> : vector<64xf32>
    %33 = vector.multi_reduction <maximumf>, %32, %cst_28 [1] : vector<64x128xf32> to vector<64xf32>
    %34 = vector.shape_cast %33 : vector<64xf32> to vector<64x1xf32>
    %35 = vector.broadcast %34 : vector<64x1xf32> to vector<64x128xf32>
    %36 = arith.subf %32, %35 : vector<64x128xf32>
    %37 = math.exp %36 : vector<64x128xf32>
    %cst_29 = arith.constant dense<0.000000e+00> : vector<64xf32>
    %38 = vector.multi_reduction <add>, %37, %cst_29 [1] : vector<64x128xf32> to vector<64xf32>
    %39 = vector.shape_cast %38 : vector<64xf32> to vector<64x1xf32>
    %40 = math.log %39 : vector<64x1xf32>
    %41 = vector.broadcast %40 : vector<64x1xf32> to vector<64x128xf32>
    %42 = arith.subf %36, %41 : vector<64x128xf32>
    %c0_30 = arith.constant 0 : index
    %c0_31 = arith.constant 0 : index
    %43 = vector.load %arg12[%c0_30, %c0_31] : memref<64x128xf32, #tpu.memory_space<vmem>>, vector<64x128xf32>
    tpu.vector_store %arg12[%c0_30, %c0_31], %42 {strides = array<i32>} : memref<64x128xf32, #tpu.memory_space<vmem>>, vector<64x128xf32>,
    return
  }
  func.func @transform_0(%arg0: i32) -> (i32, i32) {
    %c0_i32 = arith.constant 0 : i32
    %c0_i32_0 = arith.constant 0 : i32
    %c0_i32_1 = arith.constant 0 : i32
    return %c0_i32, %c0_i32_0 : i32, i32
  }
  func.func @transform_1(%arg0: i32) -> (i32, i32) {
    %c0_i32 = arith.constant 0 : i32
    %c0_i32_0 = arith.constant 0 : i32
    %c0_i32_1 = arith.constant 0 : i32
    return %c0_i32, %c0_i32_0 : i32, i32
  }
  func.func @transform_2(%arg0: i32) -> (i32, i32) {
    %c0_i32 = arith.constant 0 : i32
    %c0_i32_0 = arith.constant 0 : i32
    %c0_i32_1 = arith.constant 0 : i32
    return %c0_i32, %c0_i32_0 : i32, i32
  }
  func.func @transform_3(%arg0: i32) -> (i32, i32) {
    %c0_i32 = arith.constant 0 : i32
    %c0_i32_0 = arith.constant 0 : i32
    %c0_i32_1 = arith.constant 0 : i32
    return %c0_i32, %c0_i32_0 : i32, i32
  }
  func.func @transform_4(%arg0: i32) -> (i32, i32) {
    %c0_i32 = arith.constant 0 : i32
    %c0_i32_0 = arith.constant 0 : i32
    %c0_i32_1 = arith.constant 0 : i32
    return %c0_i32, %c0_i32_0 : i32, i32
  }
  func.func @transform_5(%arg0: i32) -> (i32, i32) {
    %c0_i32 = arith.constant 0 : i32
    %c0_i32_0 = arith.constant 0 : i32
    %c0_i32_1 = arith.constant 0 : i32
    return %c0_i32, %c0_i32_0 : i32, i32
  }
  func.func @transform_6(%arg0: i32) -> (i32, i32) {
    %c0_i32 = arith.constant 0 : i32
    %c0_i32_0 = arith.constant 0 : i32
    %c0_i32_1 = arith.constant 0 : i32
    return %c0_i32, %c0_i32_0 : i32, i32
  }
  func.func @transform_7(%arg0: i32) -> (i32, i32) {
    %c0_i32 = arith.constant 0 : i32
    %c0_i32_0 = arith.constant 0 : i32
    %c0_i32_1 = arith.constant 0 : i32
    return %c0_i32, %c0_i32_0 : i32, i32
  }
  func.func @transform_8(%arg0: i32) -> (i32, i32) {
    %c0_i32 = arith.constant 0 : i32
    %c0_i32_0 = arith.constant 0 : i32
    %c0_i32_1 = arith.constant 0 : i32
    return %c0_i32, %c0_i32_0 : i32, i32
  }
  func.func @transform_9(%arg0: i32) -> (i32, i32) {
    %c0_i32 = arith.constant 0 : i32
    %c0_i32_0 = arith.constant 0 : i32
    %c0_i32_1 = arith.constant 0 : i32
    return %c0_i32, %c0_i32_0 : i32, i32
  }
  func.func @transform_10(%arg0: i32) -> (i32, i32) {
    %c0_i32 = arith.constant 0 : i32
    %c0_i32_0 = arith.constant 0 : i32
    %c0_i32_1 = arith.constant 0 : i32
    return %c0_i32, %c0_i32_0 : i32, i32
  }
  func.func @transform_11(%arg0: i32) -> (i32, i32) {
    %c0_i32 = arith.constant 0 : i32
    %c0_i32_0 = arith.constant 0 : i32
    %c0_i32_1 = arith.constant 0 : i32
    return %c0_i32, %c0_i32_0 : i32, i32
  }
}

</mosaic_0001>

<bundles_post_ra>
// kernel: tpu_custom_call.1
= control target key start
LH: loop header
LB: loop body
LE: loop exit
PB: predicated region body
PF: predicated region fallthrough
CT: control target
= control target key end

     0   :  { %v1540_v2 = vmov 0   ;;  %s1869_s0 = inlined_call_operand.vmem [shape: bf16[64,64], index: 0, kind: input, shape index: {}]   ;;  %s1870_s1 = inlined_call_operand.vmem [shape: bf16[64,64], index: 1, kind: input, shape index: {}]   ;;  %s1871_s2 = inlined_call_operand.vmem [shape: f32[64,32], index: 2, kind: input, shape index: {}]   ;;  %s1872_s3 = inlined_call_operand.vmem [shape: f32[64,1], index: 3, kind: input, shape index: {}]   ;;  %s1873_s4 = inlined_call_operand.vmem [shape: f32[64,1], index: 4, kind: input, shape index: {}]   ;;  %s1874_s5 = inlined_call_operand.vmem [shape: f32[32,16], index: 5, kind: input, shape index: {}]   ;;  %s1875_s6 = inlined_call_operand.vmem [shape: f32[1,16], index: 6, kind: input, shape index: {}]   ;;  %s1876_s7 = inlined_call_operand.vmem [shape: f32[16,16], index: 7, kind: input, shape index: {}]   ;;  %s1877_s8 = inlined_call_operand.vmem [shape: f32[1,16], index: 8, kind: input, shape index: {}]   ;;  %s1878_s9 = inlined_call_operand.vmem [shape: f32[16,128], index: 9, kind: input, shape index: {}]   ;;  %s1879_s10 = inlined_call_operand.vmem [shape: f32[1,128], index: 10, kind: input, shape index: {}]   ;;  %s1880_s11 = inlined_call_operand.hbm [shape: f32[64,128], index: 11, kind: output, shape index: {}]  }
   0x1   :  { %v81_v0 = vld [vmem:[%s1872_s3 + $0x10] sm:$0xff]  ;;  %v79_v1 = vld [vmem:[%s1872_s3] sm:$0xff]  ;;  %1483 = vset.pattern.permute.xlu1 %v1540_v2  ;;  %1482 = vset.pattern.permute.xlu0 %v1540_v2  ;;  %v82_v3 = vld [vmem:[%s1872_s3 + $0x18] sm:$0xff] }
   0x2   :  { %99 = vperm.xlu1 %1483, %v81_v0   ;;  %89 = vperm.xlu0 %1482, %v79_v1   ;;  %v80_v4 = vld [vmem:[%s1872_s3 + $0x8] sm:$0xff]  ;;  %v135_v5 = vld [vmem:[%s1874_s5] sm:$0xff]  ;;  %v137_v8 = vld [vmem:[%s1874_s5 + $0x10] sm:$0xff] }
   0x3   :  { %v136_v6 = vld [vmem:[%s1874_s5 + $0x8] sm:$0xff]  ;;  %v83_v10 = vld [vmem:[%s1872_s3 + $0x20] sm:$0xff]  ;;  %v138_v11 = vld [vmem:[%s1874_s5 + $0x18] sm:$0xff] }
   0x4   :  { %v1406_v7 = vpack.c.bf16 %v136_v6, %v135_v5  ;;  %v84_v9 = vld [vmem:[%s1872_s3 + $0x28] sm:$0xff]  ;;  %v1410_v12 = vpack.c.bf16 %v138_v11, %v137_v8 }
   0x6   :  { %104 = vperm.xlu1 %1483, %v82_v3   ;;  %94 = vperm.xlu0 %1482, %v80_v4  }
   0x7   :  { %1407 = vmatprep.subr.bf16.mxu0 %v1406_v7 }
   0x8   :  { %16 = vsyncpa [#allocation3], 0  ;;  %1409 = vmatpush3.bf16.msra.mxu0 %v1406_v7  ;;  %v86_v13 = vld [vmem:[%s1872_s3 + $0x38] sm:$0xff]  ;;  %v85_v14 = vld [vmem:[%s1872_s3 + $0x30] sm:$0xff]  ;;  %vm139_vm0 = vcmask 261120   ;;  %vm269_vm1 = vcmask 523264  }
   0x9   :  { %1411 = vmatprep.subr.bf16.mxu0 %v1410_v12  ;;  %v400_v15 = vld [vmem:[%s1873_s4 + $0x8] sm:$0xff]  ;;  %v399_v16 = vld [vmem:[%s1873_s4] sm:$0xff]  ;;  %v402_v17 = vld [vmem:[%s1873_s4 + $0x18] sm:$0xff]  ;;  %vm480_vm2 = vcmask 130048  }
   0xa   :  { %114 = vperm.xlu1 %1483, %v84_v9   ;;  %109 = vperm.xlu0 %1482, %v83_v10   ;;  %v401_v18 = vld [vmem:[%s1873_s4 + $0x10] sm:$0xff]  ;;  %v404_v19 = vld [vmem:[%s1873_s4 + $0x28] sm:$0xff]  ;;  %v403_v20 = vld [vmem:[%s1873_s4 + $0x20] sm:$0xff] }
   0xb   :  { %v406_v21 = vld [vmem:[%s1873_s4 + $0x38] sm:$0xff]  ;;  %v405_v22 = vld [vmem:[%s1873_s4 + $0x30] sm:$0xff]  ;;  %v71_v23 = vld [vmem:[%s1871_s2] sm:$0xff] }
   0xc   :  { %1413 = vmatpush3.bf16.msra.mxu0 %v1410_v12  ;;  %v73_v26 = vld [vmem:[%s1871_s2 + $0x10] sm:$0xff]  ;;  %v72_v28 = vld [vmem:[%s1871_s2 + $0x8] sm:$0xff]  ;;  %v74_v33 = vld [vmem:[%s1871_s2 + $0x18] sm:$0xff] }
   0xd   :  { %v75_v34 = vld [vmem:[%s1871_s2 + $0x20] sm:$0xff]  ;;  %v76_v39 = vld [vmem:[%s1871_s2 + $0x28] sm:$0xff]  ;;  %v77_v40 = vld [vmem:[%s1871_s2 + $0x30] sm:$0xff] }
   0xe   :  { %124 = vperm.xlu1 %1483, %v86_v13   ;;  %119 = vperm.xlu0 %1482, %v85_v14   ;;  %v78_v45 = vld [vmem:[%s1871_s2 + $0x38] sm:$0xff]  ;;  %v1153_v47 = vld [vmem:[%s1869_s0] sm:$0xff]   ;;  %v479_v50 = vld [vmem:[%s1876_s7 + $0x8] sm:$0xff] }
   0xf   :  { %v1154_v48 = vunpack.c.l.bf16 %v1153_v47  ;;  %v478_v49 = vld [vmem:[%s1876_s7] sm:$0xff]  ;;  %v1184_v0 = vld [vmem:[%s1869_s0 + $0x8] sm:$0xff]   ;;  %v1155_v1 = vunpack.c.h.bf16 %v1153_v47  ;;  %v1185_v3 = vld [vmem:[%s1869_s0 + $0x10] sm:$0xff]  }
  0x10   :  { %v1430_v51 = vpack.c.bf16 %v479_v50, %v478_v49  ;;  %v1158_v2 = vunpack.c.l.bf16 %v1184_v0  ;;  %v1159_v4 = vunpack.c.h.bf16 %v1184_v0  ;;  %v1162_v5 = vunpack.c.l.bf16 %v1185_v3  ;;  %v1186_v6 = vld [vmem:[%s1869_s0 + $0x18] sm:$0xff]   ;;  %v1117_v14 = vld [vmem:[%s1875_s6] ss:$0 sm:$0xff] }
  0x11   :  { %1306 = vmatprep.mubr.msk.f32.mxu1 %vm269_vm1, %v1154_v48  ;;  %v1163_v7 = vunpack.c.h.bf16 %v1185_v3  ;;  %v1166_v8 = vunpack.c.l.bf16 %v1186_v6  ;;  %v1167_v9 = vunpack.c.h.bf16 %v1186_v6 }
  0x12   :  { %414 = vperm.xlu1 %1483, %v400_v15   ;;  %409 = vperm.xlu0 %1482, %v399_v16  }
  0x13   :  { %1431 = vmatprep.subr.bf16.mxu0 %v1430_v51 }
  0x16   :  { %424 = vperm.xlu1 %1483, %v402_v17   ;;  %419 = vperm.xlu0 %1482, %v401_v18  }
  0x1a   :  { %434 = vperm.xlu1 %1483, %v404_v19   ;;  %429 = vperm.xlu0 %1482, %v403_v20  }
  0x1e   :  { %444 = vperm.xlu1 %1483, %v406_v21   ;;  %439 = vperm.xlu0 %1482, %v405_v22  }
  0x81   :  { %v100_v24 = vpop.permute.xlu1 %99  ;;  %v90_v25 = vpop.permute.xlu0 %89 }
  0x82   :  { %v127_v27 = vmul.f32 %v90_v25, %v71_v23  ;;  %v129_v29 = vmul.f32 %v100_v24, %v73_v26 }
  0x84   :  { %1278 = vmatprep.mubr.msk.f32.mxu0 %vm139_vm0, %v127_v27 }
  0x85   :  { %v105_v30 = vpop.permute.xlu1 %104  ;;  %v95_v31 = vpop.permute.xlu0 %94 }
  0x86   :  { %v128_v32 = vmul.f32 %v95_v31, %v72_v28  ;;  %v130_v37 = vmul.f32 %v105_v30, %v74_v33 }
  0x88   :  { %1279 = vmatmul.mubr.msk.f32.vlgmr.msra.gmra.mrb[0].mxu0 %vm139_vm0, %v128_v32 }
  0x89   :  { %v115_v35 = vpop.permute.xlu1 %114  ;;  %v110_v36 = vpop.permute.xlu0 %109  ;;  %1281 = vmatprep.mubr.msk.f32.mxu0 %vm139_vm0, %v129_v29  ;;  %1433 = vmatpush3.bf16.msra.mxu0 %v1430_v51  ;;  %v1736_v51 = vld [vmem:[%s1870_s1] sm:$0xff]  }
  0x8a   :  { %v131_v38 = vmul.f32 %v110_v36, %v75_v34  ;;  %v132_v42 = vmul.f32 %v115_v35, %v76_v39 }
  0x8c   :  { %1282 = vmatmul.mubr.msk.f32.gmra.mrb[2].mxu0 %vm139_vm0, %v130_v37 }
  0x8d   :  { %v120_v41 = vpop.permute.xlu0 %119  ;;  %1284 = vmatprep.mubr.msk.f32.mxu0 %vm139_vm0, %v131_v38  ;;  %v125_v44 = vpop.permute.xlu1 %124 }
  0x8e   :  { %v133_v43 = vmul.f32 %v120_v41, %v77_v40  ;;  %v134_v46 = vmul.f32 %v125_v44, %v78_v45 }
  0x90   :  { %1285 = vmatmul.mubr.msk.f32.gmra.mrb[4].mxu0 %vm139_vm0, %v132_v42 }
  0x91   :  { %1287 = vmatprep.mubr.msk.f32.mxu0 %vm139_vm0, %v133_v43  ;;  %v415_v10 = vpop.permute.xlu1 %414  ;;  %v410_v11 = vpop.permute.xlu0 %409 }
  0x94   :  { %1288 = vmatmul.mubr.msk.f32.gmra.mrb[6].mxu0 %vm139_vm0, %v134_v46 }
  0x95   :  { %v425_v12 = vpop.permute.xlu1 %424  ;;  %v420_v15 = vpop.permute.xlu0 %419 }
  0x99   :  { %v435_v24 = vpop.permute.xlu1 %434  ;;  %v430_v27 = vpop.permute.xlu0 %429 }
  0x9d   :  { %v445_v38 = vpop.permute.xlu1 %444  ;;  %v440_v41 = vpop.permute.xlu0 %439 }
 0x15b   :  { %v1280_v52 = vpop.f32.mrb[0].mxu0 }
 0x15c   :  { %v230_v53 = vpop.f32.mrb[1].mxu0 }
 0x15d   :  { %v1414_v54 = vpack.c.bf16 %v1280_v52, %v230_v53  ;;  %v1170_v52 = vunpack.c.l.bf16 %v1736_v51  ;;  %v754_v53 = vld [vmem:[%s1878_s9] sm:$0xff] }
 0x15f   :  { %v1283_v55 = vpop.f32.mrb[2].mxu0  ;;  %1415 = vmatprep.subr.bf16.mxu1 %v1414_v54 }
 0x160   :  { %v240_v56 = vpop.f32.mrb[3].mxu0  ;;  %1417 = vmatpush3.bf16.msra.mxu1 %v1414_v54  ;;  %v755_v54 = vld [vmem:[%s1878_s9 + $0x8] sm:$0xff] }
 0x161   :  { %v1418_v57 = vpack.c.bf16 %v1283_v55, %v240_v56  ;;  %v1450_v55 = vpack.c.bf16 %v755_v54, %v754_v53 }
 0x163   :  { %v1286_v58 = vpop.f32.mrb[4].mxu0  ;;  %1419 = vmatprep.subr.bf16.mxu1 %v1418_v57  ;;  %1451 = vmatprep.subr.bf16.mxu0 %v1450_v55 }
 0x164   :  { %v250_v59 = vpop.f32.mrb[5].mxu0  ;;  %1421 = vmatpush3.bf16.msra.mxu1 %v1418_v57 }
 0x165   :  { %v1422_v60 = vpack.c.bf16 %v1286_v58, %v250_v59 }
 0x167   :  { %v1289_v61 = vpop.f32.mrb[6].mxu0  ;;  %1423 = vmatprep.subr.bf16.mxu1 %v1422_v60 }
 0x168   :  { %v260_v62 = vpop.f32.mrb[7].mxu0  ;;  %1425 = vmatpush3.bf16.msra.mxu1 %v1422_v60 }
 0x169   :  { %v1426_v63 = vpack.c.bf16 %v1289_v61, %v260_v62 }
 0x16b   :  { %1427 = vmatprep.subr.bf16.mxu1 %v1426_v63 }
 0x16c   :  { %1429 = vmatpush3.bf16.msra.mxu1 %v1426_v63 }
 0x16f   :  { %1307 = vmatmul.mubr.msk.f32.vlgmr.msra.gmra.mrb[0].mxu1 %vm269_vm1, %v1155_v1 }
 0x170   :  { %1309 = vmatprep.mubr.msk.f32.mxu1 %vm269_vm1, %v1158_v2 }
 0x173   :  { %1310 = vmatmul.mubr.msk.f32.gmra.mrb[2].mxu1 %vm269_vm1, %v1159_v4  ;;  %v1751_v4 = vld [vmem:[%s1870_s1 + $0x8] sm:$0xff]  }
 0x174   :  { %1312 = vmatprep.mubr.msk.f32.mxu1 %vm269_vm1, %v1162_v5  ;;  %v1171_v5 = vunpack.c.h.bf16 %v1736_v51  ;;  %v1174_v6 = vunpack.c.l.bf16 %v1751_v4  ;;  %v1143_v51 = vld [vmem:[%s1879_s10] ss:$0 sm:$0xff]  ;;  %s1541_s10 = smov [#allocation2]  }
 0x175   :  { %s1090_s12 = sshll.u32 %s1541_s10, 4  ;;  %s1091_s12 = int_to_ptr.vmem [resolvable:$true] %s1090_s12 }
 0x176   :  { %s1516_s13 = scalar_lea.vmem %s1091_s12, 1024  ;;  %p1521_p1 = scmp.lt.s32.totalorder %s1091_s12, %s1091_s12 }
 0x177   :  { %1313 = vmatmul.mubr.msk.f32.gmra.mrb[4].mxu1 %vm269_vm1, %v1163_v7  ;;  %v1758_v7 = vld [vmem:[%s1870_s1 + $0x10] sm:$0xff]   ;;  %p1517_p0 = scmp.ne.s32.totalorder %s1091_s12, %s1516_s13  ;;  %p1522_p2 = scmp.lt.s32.totalorder %s1516_s13, %s1516_s13 }
 0x178   :  { %1315 = vmatprep.mubr.msk.f32.mxu1 %vm269_vm1, %v1166_v8  ;;  %v1175_v8 = vunpack.c.h.bf16 %v1751_v4 }
 0x179   :  { %p1523_p3 = por %p1522_p2, %p1521_p1 }
 0x17b   :  { %1316 = vmatmul.mubr.msk.f32.gmra.mrb[6].mxu1 %vm269_vm1, %v1167_v9  ;;  %v1178_v9 = vunpack.c.l.bf16 %v1758_v7  ;;  %p1524_p4 = pnand %p1523_p3, %p1517_p0 }
 0x17c   :  { %1350 = vmatprep.mubr.msk.f32.mxu1 %vm269_vm1, %v1170_v52 }
 0x242   :  { %v1308_v13 = vpop.f32.mrb[0].mxu1 }
 0x243   :  { %v448_v16 = vmul.f32 %v1308_v13, %v415_v10  ;;  %v360_v17 = vpop.f32.mrb[1].mxu1  ;;  %v1769_v10 = vld [vmem:[%s1870_s1 + $0x18] sm:$0xff]  }
 0x244   :  { %v447_v18 = vmul.f32 %v410_v11, %v360_v17  ;;  %v1179_v11 = vunpack.c.h.bf16 %v1758_v7  ;;  %v1183_v13 = vunpack.c.h.bf16 %v1769_v10 }
 0x245   :  { %v463_v19 = vadd.f32 %v1117_v14, %v448_v16 }
 0x246   :  { %v462_v20 = vadd.f32 %v1117_v14, %v447_v18  ;;  %v1311_v21 = vpop.f32.mrb[2].mxu1 }
 0x247   :  { %v450_v22 = vmul.f32 %v1311_v21, %v425_v12  ;;  %v370_v23 = vpop.f32.mrb[3].mxu1  ;;  %v471_v28 = vmax.f32 %v463_v19, 0.0  ;;  %v1182_v12 = vunpack.c.l.bf16 %v1769_v10 }
 0x248   :  { %v470_v25 = vmax.f32 %v462_v20, 0.0  ;;  %v449_v26 = vmul.f32 %v420_v15, %v370_v23 }
 0x249   :  { %v465_v29 = vadd.f32 %v1117_v14, %v450_v22 }
 0x24a   :  { %v464_v30 = vadd.f32 %v1117_v14, %v449_v26  ;;  %v1314_v31 = vpop.f32.mrb[4].mxu1  ;;  %1322 = vmatprep.mubr.msk.f32.mxu0 %vm480_vm2, %v470_v25 }
 0x24b   :  { %v452_v32 = vmul.f32 %v1314_v31, %v435_v24  ;;  %v380_v33 = vpop.f32.mrb[5].mxu1  ;;  %1323 = vmatmul.mubr.msk.f32.vlgmr.msra.gmra.mrb[8].mxu0 %vm480_vm2, %v471_v28  ;;  %v473_v36 = vmax.f32 %v465_v29, 0.0 }
 0x24c   :  { %v472_v34 = vmax.f32 %v464_v30, 0.0  ;;  %v451_v35 = vmul.f32 %v430_v27, %v380_v33  ;;  %1453 = vmatpush3.bf16.msra.mxu0 %v1450_v55 }
 0x24d   :  { %v467_v37 = vadd.f32 %v1117_v14, %v452_v32 }
 0x24e   :  { %v466_v39 = vadd.f32 %v1117_v14, %v451_v35  ;;  %v1317_v40 = vpop.f32.mrb[6].mxu1  ;;  %1325 = vmatprep.mubr.msk.f32.mxu0 %vm480_vm2, %v472_v34 }
 0x24f   :  { %v454_v42 = vmul.f32 %v1317_v40, %v445_v38  ;;  %v390_v43 = vpop.f32.mrb[7].mxu1  ;;  %1326 = vmatmul.mubr.msk.f32.gmra.mrb[10].mxu0 %vm480_vm2, %v473_v36  ;;  %v475_v46 = vmax.f32 %v467_v37, 0.0 }
 0x250   :  { %v474_v44 = vmax.f32 %v466_v39, 0.0  ;;  %v453_v45 = vmul.f32 %v440_v41, %v390_v43 }
 0x251   :  { %v469_v47 = vadd.f32 %v1117_v14, %v454_v42 }
 0x252   :  { %v468_v48 = vadd.f32 %v1117_v14, %v453_v45  ;;  %1328 = vmatprep.mubr.msk.f32.mxu0 %vm480_vm2, %v474_v44  ;;  %v1126_v14 = vld [vmem:[%s1877_s8] ss:$0 sm:$0xff] }
 0x253   :  { %1329 = vmatmul.mubr.msk.f32.gmra.mrb[12].mxu0 %vm480_vm2, %v475_v46  ;;  %v477_v50 = vmax.f32 %v469_v47, 0.0 }
 0x254   :  { %v476_v49 = vmax.f32 %v468_v48, 0.0 }
 0x256   :  { %1331 = vmatprep.mubr.msk.f32.mxu0 %vm480_vm2, %v476_v49 }
 0x257   :  { %1332 = vmatmul.mubr.msk.f32.gmra.mrb[14].mxu0 %vm480_vm2, %v477_v50 }
 0x31e   :  { %v1324_v56 = vpop.f32.mrb[8].mxu0 }
 0x31f   :  { %v571_v57 = vpop.f32.mrb[9].mxu0 }
 0x320   :  { %v1434_v58 = vpack.c.bf16 %v1324_v56, %v571_v57 }
 0x322   :  { %v1327_v59 = vpop.f32.mrb[10].mxu0  ;;  %1435 = vmatprep.subr.bf16.mxu1 %v1434_v58 }
 0x323   :  { %v581_v60 = vpop.f32.mrb[11].mxu0  ;;  %1437 = vmatpush3.bf16.msra.mxu1 %v1434_v58 }
 0x324   :  { %v1438_v61 = vpack.c.bf16 %v1327_v59, %v581_v60 }
 0x326   :  { %v1330_v62 = vpop.f32.mrb[12].mxu0  ;;  %1439 = vmatprep.subr.bf16.mxu1 %v1438_v61 }
 0x327   :  { %v591_v63 = vpop.f32.mrb[13].mxu0  ;;  %1441 = vmatpush3.bf16.msra.mxu1 %v1438_v61 }
 0x328   :  { %v1442_v0 = vpack.c.bf16 %v1330_v62, %v591_v63 }
 0x32a   :  { %v1333_v1 = vpop.f32.mrb[14].mxu0  ;;  %1443 = vmatprep.subr.bf16.mxu1 %v1442_v0 }
 0x32b   :  { %v601_v2 = vpop.f32.mrb[15].mxu0  ;;  %1445 = vmatpush3.bf16.msra.mxu1 %v1442_v0 }
 0x32c   :  { %v1446_v3 = vpack.c.bf16 %v1333_v1, %v601_v2 }
 0x32e   :  { %1447 = vmatprep.subr.bf16.mxu1 %v1446_v3 }
 0x32f   :  { %1449 = vmatpush3.bf16.msra.mxu1 %v1446_v3 }
 0x332   :  { %1351 = vmatmul.mubr.msk.f32.vlgmr.msra.gmra.mrb[8].mxu1 %vm269_vm1, %v1171_v5 }
 0x333   :  { %1353 = vmatprep.mubr.msk.f32.mxu1 %vm269_vm1, %v1174_v6 }
 0x336   :  { %1354 = vmatmul.mubr.msk.f32.gmra.mrb[10].mxu1 %vm269_vm1, %v1175_v8 }
 0x337   :  { %1356 = vmatprep.mubr.msk.f32.mxu1 %vm269_vm1, %v1178_v9 }
 0x33a   :  { %1357 = vmatmul.mubr.msk.f32.gmra.mrb[12].mxu1 %vm269_vm1, %v1179_v11 }
 0x33b   :  { %1359 = vmatprep.mubr.msk.f32.mxu1 %vm269_vm1, %v1182_v12 }
 0x33e   :  { %1360 = vmatmul.mubr.msk.f32.gmra.mrb[14].mxu1 %vm269_vm1, %v1183_v13 }
 0x33f   :  { %1397 = vmatprep.mubr.msk.f32.mxu1 %vm269_vm1, %v1174_v6 }
 0x405   :  { %v1352_v15 = vpop.f32.mrb[8].mxu1 }
 0x406   :  { %v713_v16 = vadd.f32 %v1352_v15, %v1126_v14  ;;  %v707_v17 = vpop.f32.mrb[9].mxu1 }
 0x407   :  { %v708_v18 = vadd.f32 %v1126_v14, %v707_v17 }
 0x408   :  { %v747_v21 = vmax.f32 %v713_v16, 0.0 }
 0x409   :  { %v746_v19 = vmax.f32 %v708_v18, 0.0  ;;  %v1355_v20 = vpop.f32.mrb[10].mxu1 }
 0x40a   :  { %v723_v22 = vadd.f32 %v1355_v20, %v1126_v14  ;;  %v717_v23 = vpop.f32.mrb[11].mxu1 }
 0x40b   :  { %v718_v24 = vadd.f32 %v1126_v14, %v717_v23  ;;  %1366 = vmatprep.mubr.msk.f32.mxu0 %vm480_vm2, %v746_v19 }
 0x40c   :  { %1367 = vmatmul.mubr.msk.f32.vlgmr.msra.gmra.mrb[16].mxu0 %vm480_vm2, %v747_v21  ;;  %v749_v27 = vmax.f32 %v723_v22, 0.0 }
 0x40d   :  { %v748_v25 = vmax.f32 %v718_v24, 0.0  ;;  %v1358_v26 = vpop.f32.mrb[12].mxu1 }
 0x40e   :  { %v733_v28 = vadd.f32 %v1358_v26, %v1126_v14  ;;  %v727_v29 = vpop.f32.mrb[13].mxu1 }
 0x40f   :  { %v728_v30 = vadd.f32 %v1126_v14, %v727_v29  ;;  %1369 = vmatprep.mubr.msk.f32.mxu0 %vm480_vm2, %v748_v25 }
 0x410   :  { %1370 = vmatmul.mubr.msk.f32.gmra.mrb[18].mxu0 %vm480_vm2, %v749_v27  ;;  %v751_v33 = vmax.f32 %v733_v28, 0.0 }
 0x411   :  { %v750_v31 = vmax.f32 %v728_v30, 0.0  ;;  %v1361_v32 = vpop.f32.mrb[14].mxu1 }
 0x412   :  { %v743_v34 = vadd.f32 %v1361_v32, %v1126_v14  ;;  %v737_v35 = vpop.f32.mrb[15].mxu1 }
 0x413   :  { %v738_v36 = vadd.f32 %v1126_v14, %v737_v35  ;;  %1372 = vmatprep.mubr.msk.f32.mxu0 %vm480_vm2, %v750_v31 }
 0x414   :  { %1373 = vmatmul.mubr.msk.f32.gmra.mrb[20].mxu0 %vm480_vm2, %v751_v33  ;;  %v753_v38 = vmax.f32 %v743_v34, 0.0 }
 0x415   :  { %v752_v37 = vmax.f32 %v738_v36, 0.0 }
 0x417   :  { %1375 = vmatprep.mubr.msk.f32.mxu0 %vm480_vm2, %v752_v37 }
 0x418   :  { %1376 = vmatmul.mubr.msk.f32.gmra.mrb[22].mxu0 %vm480_vm2, %v753_v38 }
 0x419   :  { %1394 = vmatprep.mubr.msk.f32.mxu0 %vm269_vm1, %v1170_v52 }
 0x4df   :  { %v1368_v39 = vpop.f32.mrb[16].mxu0 }
 0x4e0   :  { %v846_v40 = vpop.f32.mrb[17].mxu0 }
 0x4e1   :  { %v1454_v41 = vpack.c.bf16 %v1368_v39, %v846_v40 }
 0x4e3   :  { %v1371_v42 = vpop.f32.mrb[18].mxu0  ;;  %1455 = vmatprep.subr.bf16.mxu0 %v1454_v41  ;;  %1470 = vmatprep.subr.bf16.mxu1 %v1454_v41 }
 0x4e4   :  { %v856_v43 = vpop.f32.mrb[19].mxu0  ;;  %1457 = vmatpush3.bf16.msra.mxu0 %v1454_v41  ;;  %1474 = vmatpush3.bf16.msra.mxu1 %v1454_v41 }
 0x4e5   :  { %v1458_v44 = vpack.c.bf16 %v1371_v42, %v856_v43 }
 0x4e7   :  { %v1374_v45 = vpop.f32.mrb[20].mxu0  ;;  %1459 = vmatprep.subr.bf16.mxu0 %v1458_v44  ;;  %1471 = vmatprep.subr.bf16.mxu1 %v1458_v44 }
 0x4e8   :  { %v866_v46 = vpop.f32.mrb[21].mxu0  ;;  %1461 = vmatpush3.bf16.msra.mxu0 %v1458_v44  ;;  %1475 = vmatpush3.bf16.msra.mxu1 %v1458_v44 }
 0x4e9   :  { %v1462_v47 = vpack.c.bf16 %v1374_v45, %v866_v46 }
 0x4eb   :  { %v1377_v48 = vpop.f32.mrb[22].mxu0  ;;  %1463 = vmatprep.subr.bf16.mxu0 %v1462_v47  ;;  %1472 = vmatprep.subr.bf16.mxu1 %v1462_v47 }
 0x4ec   :  { %v876_v49 = vpop.f32.mrb[23].mxu0  ;;  %1465 = vmatpush3.bf16.msra.mxu0 %v1462_v47  ;;  %1476 = vmatpush3.bf16.msra.mxu1 %v1462_v47 }
 0x4ed   :  { %v1466_v50 = vpack.c.bf16 %v1377_v48, %v876_v49 }
 0x4ef   :  { %1467 = vmatprep.subr.bf16.mxu0 %v1466_v50  ;;  %1473 = vmatprep.subr.bf16.mxu1 %v1466_v50 }
 0x4f0   :  { %1469 = vmatpush3.bf16.msra.mxu0 %v1466_v50  ;;  %1477 = vmatpush3.bf16.msra.mxu1 %v1466_v50 }
 0x4f3   :  { %1395 = vmatmul.mubr.msk.f32.vlgmr.msra.gmra.mrb[24].mxu0 %vm269_vm1, %v1171_v5  ;;  %1398 = vmatmul.mubr.msk.f32.vlgmr.msra.gmra.mrb[16].mxu1 %vm269_vm1, %v1175_v8 }
 0x4f4   :  { %1400 = vmatprep.mubr.msk.f32.mxu1 %vm269_vm1, %v1178_v9 }
 0x4f7   :  { %1401 = vmatmul.mubr.msk.f32.gmra.mrb[18].mxu1 %vm269_vm1, %v1179_v11 }
 0x4f8   :  { %1403 = vmatprep.mubr.msk.f32.mxu1 %vm269_vm1, %v1182_v12 }
 0x4fb   :  { %1404 = vmatmul.mubr.msk.f32.gmra.mrb[20].mxu1 %vm269_vm1, %v1183_v13 }
 0x5c6   :  { %v1396_v52 = vpop.f32.mrb[24].mxu0  ;;  %v1399_v53 = vpop.f32.mrb[16].mxu1 }
 0x5c7   :  { %v964_v54 = vadd.f32 %v1396_v52, %v1143_v51  ;;  %v974_v55 = vadd.f32 %v1399_v53, %v1143_v51  ;;  %v968_v56 = vpop.f32.mrb[17].mxu1  ;;  %v958_v57 = vpop.f32.mrb[25].mxu0 }
 0x5c8   :  { %v959_v58 = vadd.f32 %v1143_v51, %v958_v57  ;;  %v969_v63 = vadd.f32 %v1143_v51, %v968_v56 }
 0x5c9   :  { %1003 = vmax.xlane.f32.xlu0 %v974_v55  ;;  %999 = vmax.xlane.f32.xlu1 %v964_v54 }
 0x5ca   :  { %v1402_v59 = vpop.f32.mrb[18].mxu1 }
 0x5cb   :  { %v978_v60 = vpop.f32.mrb[19].mxu1  ;;  %v984_v2 = vadd.f32 %v1402_v59, %v1143_v51 }
 0x5cc   :  { %v979_v61 = vadd.f32 %v1143_v51, %v978_v60 }
 0x5cd   :  { %997 = vmax.xlane.f32.xlu0 %v959_v58 }
 0x5ce   :  { %v1405_v62 = vpop.f32.mrb[20].mxu1  ;;  %1005 = vmax.xlane.f32.xlu1 %v979_v61 }
 0x5cf   :  { %v988_v0 = vpop.f32.mrb[21].mxu1  ;;  %v994_v3 = vadd.f32 %v1405_v62, %v1143_v51 }
 0x5d0   :  { %v989_v1 = vadd.f32 %v1143_v51, %v988_v0 }
 0x5d1   :  { %1001 = vmax.xlane.f32.xlu0 %v969_v63 }
 0x5d2   :  { %1009 = vmax.xlane.f32.xlu1 %v989_v1 }
 0x5d5   :  { %1007 = vmax.xlane.f32.xlu0 %v984_v2 }
 0x5d9   :  { %1011 = vmax.xlane.f32.xlu0 %v994_v3 }
 0x656   :  { %v1004_v4 = vpop.xlane.xlu0 %1003  ;;  %v1000_v5 = vpop.xlane.xlu1 %999 }
 0x657   :  { %v1825_v6 = vsub.f32 %v964_v54, %v1000_v5  ;;  %v1827_v7 = vsub.f32 %v974_v55, %v1004_v4 }
 0x659   :  { %v1023_v8 = vmul.f32 1.442695, %v1825_v6  ;;  %v1027_v12 = vmul.f32 1.442695, %v1827_v7 }
 0x65a   :  { %v998_v9 = vpop.xlane.xlu0 %997 }
 0x65b   :  { %v1830_v10 = vsub.f32 %v959_v58, %v998_v9  ;;  %v1006_v11 = vpop.xlane.xlu1 %1005  ;;  %1484 = vpow2.f32 %v1023_v8 }
 0x65c   :  { %v1834_v14 = vsub.f32 %v979_v61, %v1006_v11 }
 0x65d   :  { %v1021_v13 = vmul.f32 1.442695, %v1830_v10 }
 0x65e   :  { %v1002_v15 = vpop.xlane.xlu0 %1001  ;;  %v1029_v19 = vmul.f32 1.442695, %v1834_v14 }
 0x65f   :  { %1486 = vpow2.f32 %v1021_v13  ;;  %v1836_v16 = vsub.f32 %v969_v63, %v1002_v15  ;;  %v1010_v17 = vpop.xlane.xlu1 %1009 }
 0x660   :  { %1488 = vpow2.f32 %v1027_v12  ;;  %v1840_v20 = vsub.f32 %v989_v1, %v1010_v17 }
 0x661   :  { %v1025_v18 = vmul.f32 1.442695, %v1836_v16 }
 0x662   :  { %v1008_v21 = vpop.xlane.xlu0 %1007  ;;  %v1033_v25 = vmul.f32 1.442695, %v1840_v20 }
 0x663   :  { %1490 = vpow2.f32 %v1025_v18  ;;  %v1842_v22 = vsub.f32 %v984_v2, %v1008_v21 }
 0x664   :  { %1492 = vpow2.f32 %v1029_v19 }
 0x665   :  { %v1031_v23 = vmul.f32 1.442695, %v1842_v22  ;;  %v1485_v24 = vpop.eup %1484 }
 0x666   :  { %v1012_v26 = vpop.xlane.xlu0 %1011  ;;  %1039 = vadd.xlane.f32.xlu0 %v1485_v24 }
 0x667   :  { %1494 = vpow2.f32 %v1031_v23  ;;  %v1846_v27 = vsub.f32 %v994_v3, %v1012_v26 }
 0x668   :  { %1496 = vpow2.f32 %v1033_v25 }
 0x669   :  { %v1487_v28 = vpop.eup %1486  ;;  %v1035_v29 = vmul.f32 1.442695, %v1846_v27 }
 0x66a   :  { %v1489_v30 = vpop.eup %1488  ;;  %1037 = vadd.xlane.f32.xlu1 %v1487_v28 }
 0x66b   :  { %1498 = vpow2.f32 %v1035_v29  ;;  %1043 = vadd.xlane.f32.xlu0 %v1489_v30 }
 0x66d   :  { %v1491_v31 = vpop.eup %1490 }
 0x66e   :  { %1041 = vadd.xlane.f32.xlu1 %v1491_v31  ;;  %v1493_v32 = vpop.eup %1492 }
 0x671   :  { %v1495_v33 = vpop.eup %1494 }
 0x672   :  { %1045 = vadd.xlane.f32.xlu1 %v1493_v32  ;;  %1047 = vadd.xlane.f32.xlu0 %v1495_v33  ;;  %v1497_v34 = vpop.eup %1496 }
 0x675   :  { %v1499_v35 = vpop.eup %1498 }
 0x676   :  { %1049 = vadd.xlane.f32.xlu1 %v1497_v34  ;;  %1051 = vadd.xlane.f32.xlu0 %v1499_v35 }
 0x6f3   :  { %v1040_v36 = vpop.xlane.xlu0 %1039 }
 0x6f4   :  { %1500 = vlog2.f32 %v1040_v36 }
 0x6f7   :  { %v1038_v37 = vpop.xlane.xlu1 %1037 }
 0x6f8   :  { %1502 = vlog2.f32 %v1038_v37  ;;  %v1044_v38 = vpop.xlane.xlu0 %1043 }
 0x6f9   :  { %1504 = vlog2.f32 %v1044_v38 }
 0x6fb   :  { %v1042_v39 = vpop.xlane.xlu1 %1041 }
 0x6fc   :  { %1506 = vlog2.f32 %v1042_v39 }
 0x6fe   :  { %v1501_v40 = vpop.eup %1500 }
 0x6ff   :  { %v1046_v41 = vpop.xlane.xlu1 %1045  ;;  %v1048_v42 = vpop.xlane.xlu0 %1047  ;;  %v1056_v43 = vmul.f32 0.6931472, %v1501_v40 }
 0x700   :  { %1508 = vlog2.f32 %v1046_v41 }
 0x701   :  { %1510 = vlog2.f32 %v1048_v42  ;;  %v1070_v45 = vsub.f32 %v1825_v6, %v1056_v43 }
 0x702   :  { %v1503_v44 = vpop.eup %1502 }
 0x703   :  { %v1505_v46 = vpop.eup %1504  ;;  %v1054_v47 = vmul.f32 0.6931472, %v1503_v44  ;;  %v1050_v48 = vpop.xlane.xlu1 %1049  ;;  %1078 = vst [vmem:[#allocation2 + $0x8] sm:$0xff] %v1070_v45 }
 0x704   :  { %v1052_v49 = vpop.xlane.xlu0 %1051  ;;  %v1060_v50 = vmul.f32 0.6931472, %v1505_v46  ;;  %1512 = vlog2.f32 %v1050_v48 }
 0x705   :  { %v1069_v51 = vsub.f32 %v1830_v10, %v1054_v47  ;;  %1514 = vlog2.f32 %v1052_v49 }
 0x706   :  { %v1507_v52 = vpop.eup %1506  ;;  %v1072_v53 = vsub.f32 %v1827_v7, %v1060_v50 }
 0x707   :  { %1077 = vst [vmem:[#allocation2] sm:$0xff] %v1069_v51  ;;  %v1058_v54 = vmul.f32 0.6931472, %v1507_v52 }
 0x708   :  { %1080 = vst [vmem:[#allocation2 + $0x18] sm:$0xff] %v1072_v53 }
 0x709   :  { %v1071_v55 = vsub.f32 %v1836_v16, %v1058_v54 }
 0x70a   :  { %v1509_v56 = vpop.eup %1508 }
 0x70b   :  { %v1511_v57 = vpop.eup %1510  ;;  %1079 = vst [vmem:[#allocation2 + $0x10] sm:$0xff] %v1071_v55  ;;  %v1062_v58 = vmul.f32 0.6931472, %v1509_v56 }
 0x70c   :  { %v1064_v59 = vmul.f32 0.6931472, %v1511_v57 }
 0x70d   :  { %v1073_v60 = vsub.f32 %v1834_v14, %v1062_v58 }
 0x70e   :  { %v1513_v61 = vpop.eup %1512  ;;  %v1074_v62 = vsub.f32 %v1842_v22, %v1064_v59 }
 0x70f   :  { %v1515_v63 = vpop.eup %1514  ;;  %1081 = vst [vmem:[#allocation2 + $0x20] sm:$0xff] %v1073_v60  ;;  %v1066_v0 = vmul.f32 0.6931472, %v1513_v61 }
 0x710   :  { %1082 = vst [vmem:[#allocation2 + $0x28] sm:$0xff] %v1074_v62  ;;  %v1068_v1 = vmul.f32 0.6931472, %v1515_v63 }
 0x711   :  { %v1075_v2 = vsub.f32 %v1840_v20, %v1066_v0 }
 0x712   :  { %v1076_v3 = vsub.f32 %v1846_v27, %v1068_v1 }
 0x713   :  { %1083 = vst [vmem:[#allocation2 + $0x30] sm:$0xff] %v1075_v2 }
 0x714   :  { %1084 = vst [vmem:[#allocation2 + $0x38] sm:$0xff] %v1076_v3 }
 0x715   :  { %1527 = shalt.err (!%p1524_p4)
}
 0x716   :  { %s1528_s15 = scalar_lea.hbm %s1880_s11, 1024 }
 0x717   :  { %p1529_p5 = scmp.ne.s32.totalorder %s1880_s11, %s1528_s15  ;;  %p1532_p6 = scmp.lt.u32.totalorder %s1528_s15, %s1880_s11 }
 0x719   :  { %p1534_p7 = pnand %p1532_p6, %p1529_p5 }
 0x71b   :  { %1537 = shalt.err (!%p1534_p7)
}
 0x71c   :  { %s1542_s19 = smov 128   ;;  %s1543_s20 = smov 8  }
 0x71d   :  { %1096 = dma.vmem_to_hbm [thread:$0]  %s1091_s12, 1024, %s1880_s11, [#allocation3], %s1542_s19, %s1542_s19, %s1543_s20  }
 0x71e   :  { %1538 = dma.done.wait [#allocation3], 1024  }
 0x71f   :  { %1539 = vsyncadd [#allocation3], 4294966272 }
 0x720   :  { %1100 = vsyncpa [#allocation3], 1 }

</bundles_post_ra>
